<compile_context>
chip_gen: v6e
topology: v6e:2x2x1
jax: 0.10.0
libtpu: 0.0.40
codegen_flags: <defaults>
</compile_context>

<pallas_src>
import functools

import jax
import jax.numpy as jnp
from jax import lax
from jax.experimental import pallas as pl
from jax.experimental.pallas import tpu as pltpu

EPS = 1e-5


def _round_up(n, m):
    return (n + m - 1) // m * m


def _pad_to(a, shape):
    pads = [(0, t - s) for s, t in zip(a.shape, shape)]
    if any(p[1] for p in pads):
        a = jnp.pad(a, pads)
    return a


def _vmem_capacity_bytes():
    try:
        return int(pltpu.get_tpu_info().vmem_capacity_bytes)
    except Exception:
        return 64 << 20  # conservative fallback (v7x per-TC VMEM)


def _prenorm_linear_kernel(x_ref, gamma_ref, beta_ref, w_ref, b_ref, o_ref,
                           y_ref, *, d_real):
    """One (tm, d_pad) row tile: LayerNorm(last axis) + affine cached at j==0,
    then the cached activations hit the MXU for each (d_pad, tn) W tile."""

    @pl.when(pl.program_id(1) == 0)
    def _():
        x = x_ref[...].astype(jnp.float32)
        inv_d = jnp.float32(1.0 / d_real)
        # Padded feature columns are zero, so plain sums give the statistics
        # over the REAL features (sum-of-squares form: no iota/where mask).
        mean = jnp.sum(x, axis=-1, keepdims=True) * inv_d
        ex2 = jnp.sum(x * x, axis=-1, keepdims=True) * inv_d
        var = jnp.maximum(ex2 - mean * mean, 0.0)
        xn = (x - mean) * lax.rsqrt(var + EPS)
        y = xn * gamma_ref[...].astype(jnp.float32) + beta_ref[...].astype(jnp.float32)
        # Cache in the matmul dtype (bf16 W -> bf16 MXU feed; f32 stays f32).
        y_ref[...] = y.astype(y_ref.dtype)

    out = jnp.dot(y_ref[...], w_ref[...], preferred_element_type=jnp.float32)
    o_ref[...] = (out + b_ref[...].astype(jnp.float32)).astype(o_ref.dtype)


def prenorm_linear(x, gamma, beta, w, b, *, tile_rows=None, tile_n=None,
                   vmem_limit_bytes=None):
    """PreNorm with fn = Linear: LayerNorm(x, last axis) -> affine -> x @ w + b.

    x: (B, N, D); gamma/beta: (D,); w: (D, D_out); b: (D_out,).
    Returns (B, N, D_out) in x.dtype.
    """
    B, N, D = x.shape
    D_out = w.shape[1]
    rows = B * N

    d_pad = _round_up(D, 128)

    # --- VMEM budget: ~75% of physical capacity (96 MiB on v5e/v6e, 48 MiB on
    #     v7x), never the full amount -> headroom for compiler scratch. ---
    if vmem_limit_bytes is None:
        vmem_limit_bytes = _vmem_capacity_bytes() * 3 // 4
    vmem_limit_bytes = int(vmem_limit_bytes)

    x_sz = jnp.dtype(x.dtype).itemsize
    w_sz = jnp.dtype(w.dtype).itemsize
    o_sz = x_sz
    mm_dtype = w.dtype            # bf16 weights stay bf16 on the MXU
    mm_sz = jnp.dtype(mm_dtype).itemsize

    # --- D_out (lane) tile. ---
    tn_cap = 1024 if tile_n is None else tile_n
    tn = min(_round_up(tn_cap, 128), _round_up(D_out, 128))
    dout_pad = _round_up(D_out, tn)
    num_n_tiles = dout_pad // tn

    # --- Row tile sized against the VMEM budget: double-buffered x and out,
    #     double-buffered W column tile, plus the cached-LN scratch. ---
    sub = max(8, 32 // x_sz)                      # sublane packing per dtype
    fixed = 2 * d_pad * tn * w_sz + 2 * (2 * d_pad + tn) * 4
    per_row = 2 * d_pad * x_sz + 2 * tn * o_sz + d_pad * mm_sz
    avail = max(vmem_limit_bytes - fixed - (4 << 20), per_row * sub)
    tm_cap = 1024 if tile_rows is None else tile_rows
    tm = min(tm_cap, avail // per_row, _round_up(rows, sub))
    tm = max(sub, tm // sub * sub)

    num_row_tiles = pl.cdiv(rows, tm)

    # Only feature axes are zero-padded; rows stay ragged (Pallas clips the
    # trailing partial block; garbage rows are row-independent and discarded).
    x2 = _pad_to(x.reshape(rows, D), (rows, d_pad))
    gamma2 = _pad_to(gamma.reshape(1, D), (1, d_pad))
    beta2 = _pad_to(beta.reshape(1, D), (1, d_pad))
    w2 = _pad_to(w, (d_pad, dout_pad))
    b2 = _pad_to(b.reshape(1, D_out), (1, dout_pad))

    kernel = functools.partial(_prenorm_linear_kernel, d_real=D)

    out2 = pl.pallas_call(
        kernel,
        out_shape=jax.ShapeDtypeStruct((rows, dout_pad), x.dtype),
        grid_spec=pltpu.PrefetchScalarGridSpec(
            num_scalar_prefetch=0,
            grid=(num_row_tiles, num_n_tiles),
            in_specs=[
                pl.BlockSpec((tm, d_pad), lambda i, j: (i, 0)),   # x row tile
                pl.BlockSpec((1, d_pad), lambda i, j: (0, 0)),    # gamma
                pl.BlockSpec((1, d_pad), lambda i, j: (0, 0)),    # beta
                pl.BlockSpec((d_pad, tn), lambda i, j: (0, j)),   # W column tile
                pl.BlockSpec((1, tn), lambda i, j: (0, j)),       # bias
            ],
            out_specs=pl.BlockSpec((tm, tn), lambda i, j: (i, j)),
            scratch_shapes=[pltpu.VMEM((tm, d_pad), mm_dtype)],   # cached LN(x)
        ),
        compiler_params=pltpu.CompilerParams(
            dimension_semantics=("parallel", "arbitrary"),
            vmem_limit_bytes=vmem_limit_bytes,
        ),
    )(x2, gamma2, beta2, w2, b2)

    if dout_pad != D_out:
        out2 = out2[:, :D_out]
    return out2.reshape(B, N, D_out)


def _reference(x, gamma, beta, w, b):
    xf = x.astype(jnp.float32)
    mean = jnp.mean(xf, axis=-1, keepdims=True)
    var = jnp.mean((xf - mean) ** 2, axis=-1, keepdims=True)
    y = (xf - mean) * lax.rsqrt(var + EPS)
    y = y * gamma.astype(jnp.float32) + beta.astype(jnp.float32)
    if w.dtype != jnp.float32:
        y = y.astype(w.dtype)
    out = jnp.dot(y, w, preferred_element_type=jnp.float32) + b.astype(jnp.float32)
    return out.astype(x.dtype)


if __name__ == "__main__":
    key = jax.random.PRNGKey(0)
    k1, k2, k3, k4 = jax.random.split(key, 4)

    # --- Case 1: f32, module-native shapes (dim=32 -> padded to 128 lanes). ---
    B, N, D = 2, 8, 32
    x = jax.random.normal(k1, (B, N, D), dtype=jnp.float32)
    gamma = jnp.ones((D,), dtype=jnp.float32)   # nn.LayerNorm default init
    beta = jnp.zeros((D,), dtype=jnp.float32)
    w = jax.random.normal(k2, (D, D), dtype=jnp.float32) * (1.0 / jnp.sqrt(D))
    b = jax.random.normal(k3, (D,), dtype=jnp.float32) * 0.01

    out = jax.block_until_ready(prenorm_linear(x, gamma, beta, w, b))
    ref = _reference(x, gamma, beta, w, b)
    assert out.shape == (B, N, D)
    assert jnp.allclose(out, ref, atol=1e-4, rtol=1e-4)

    # --- Case 2: bf16 weights/activations, ragged row count (exercises the
    #     partial trailing row block + bf16 MXU path). ---
    B2, N2, D2 = 2, 13, 128
    x_bf = jax.random.normal(k4, (B2, N2, D2), dtype=jnp.float32).astype(jnp.bfloat16)
    gamma2 = jnp.ones((D2,), dtype=jnp.float32)
    beta2 = jnp.zeros((D2,), dtype=jnp.float32)
    kw2, kb2 = jax.random.split(k3)
    w_bf = (jax.random.normal(kw2, (D2, D2), dtype=jnp.float32)
            * (1.0 / jnp.sqrt(D2))).astype(jnp.bfloat16)
    b_bf = (jax.random.normal(kb2, (D2,), dtype=jnp.float32) * 0.01).astype(jnp.bfloat16)

    out_bf = jax.block_until_ready(prenorm_linear(x_bf, gamma2, beta2, w_bf, b_bf))
    ref_bf = _reference(x_bf, gamma2, beta2, w_bf, b_bf)
    assert out_bf.shape == (B2, N2, D2)
    assert jnp.allclose(out_bf.astype(jnp.float32), ref_bf.astype(jnp.float32),
                        atol=3e-2, rtol=3e-2)

    print("KERNEL_OK")
</pallas_src>

<mosaic_0001>
module attributes {stable_mosaic.version = 11 : i64} {
  func.func @_prenorm_linear_kernel(%arg0: i32, %arg1: i32, %arg2: memref<16x128xf32, #tpu.memory_space<vmem>>, %arg3: memref<1x128xf32, #tpu.memory_space<vmem>>, %arg4: memref<1x128xf32, #tpu.memory_space<vmem>>, %arg5: memref<128x128xf32, #tpu.memory_space<vmem>>, %arg6: memref<1x128xf32, #tpu.memory_space<vmem>>, %arg7: memref<16x128xf32, #tpu.memory_space<vmem>>, %arg8: memref<16x128xf32, #tpu.memory_space<vmem>>) attributes {dimension_semantics = [#tpu.dimension_semantics<parallel>, #tpu.dimension_semantics<arbitrary>], iteration_bounds = array<i64: 1, 1>, scalar_prefetch = 0 : i64, scratch_operands = 1 : i64, tpu.core_type = #tpu.core_type<tc>, window_params = [{transform_indices = @transform_0, window_bounds = array<i64: 16, 128>}, {pipeline_mode = #tpu.pipeline_mode<synchronous>, transform_indices = @transform_1, window_bounds = array<i64: 1, 128>}, {pipeline_mode = #tpu.pipeline_mode<synchronous>, transform_indices = @transform_2, window_bounds = array<i64: 1, 128>}, {transform_indices = @transform_3, window_bounds = array<i64: 128, 128>}, {transform_indices = @transform_4, window_bounds = array<i64: 1, 128>}, {transform_indices = @transform_5, window_bounds = array<i64: 16, 128>}]} {
    %c0_i32 = arith.constant 0 : i32
    %0 = arith.cmpi eq, %arg1, %c0_i32 : i32
    %1 = arith.extui %0 : i1 to i32
    %c0_i32_0 = arith.constant 0 : i32
    %2 = arith.cmpi ne, %1, %c0_i32_0 : i32
    scf.if %2 {
      %c0_8 = arith.constant 0 : index
      %c0_9 = arith.constant 0 : index
      %10 = vector.load %arg2[%c0_8, %c0_9] : memref<16x128xf32, #tpu.memory_space<vmem>>, vector<16x128xf32>
      %cst_10 = arith.constant dense<0.000000e+00> : vector<16xf32>
      %11 = vector.multi_reduction <add>, %10, %cst_10 [1] : vector<16x128xf32> to vector<16xf32>
      %12 = vector.shape_cast %11 : vector<16xf32> to vector<16x1xf32>
      %cst_11 = arith.constant 3.125000e-02 : f32
      %13 = vector.broadcast %cst_11 : f32 to vector<16x1xf32>
      %14 = arith.mulf %12, %13 : vector<16x1xf32>
      %15 = arith.mulf %10, %10 : vector<16x128xf32>
      %cst_12 = arith.constant dense<0.000000e+00> : vector<16xf32>
      %16 = vector.multi_reduction <add>, %15, %cst_12 [1] : vector<16x128xf32> to vector<16xf32>
      %17 = vector.shape_cast %16 : vector<16xf32> to vector<16x1xf32>
      %cst_13 = arith.constant 3.125000e-02 : f32
      %18 = vector.broadcast %cst_13 : f32 to vector<16x1xf32>
      %19 = arith.mulf %17, %18 : vector<16x1xf32>
      %20 = arith.mulf %14, %14 : vector<16x1xf32>
      %21 = arith.subf %19, %20 : vector<16x1xf32>
      %cst_14 = arith.constant 0.000000e+00 : f32
      %22 = vector.broadcast %cst_14 : f32 to vector<16x1xf32>
      %23 = arith.maximumf %21, %22 : vector<16x1xf32>
      %24 = vector.broadcast %14 : vector<16x1xf32> to vector<16x128xf32>
      %25 = arith.subf %10, %24 : vector<16x128xf32>
      %cst_15 = arith.constant 9.99999974E-6 : f32
      %26 = vector.broadcast %cst_15 : f32 to vector<16x1xf32>
      %27 = arith.addf %23, %26 : vector<16x1xf32>
      %28 = math.rsqrt %27 : vector<16x1xf32>
      %29 = vector.broadcast %28 : vector<16x1xf32> to vector<16x128xf32>
      %30 = arith.mulf %25, %29 : vector<16x128xf32>
      %c0_16 = arith.constant 0 : index
      %c0_17 = arith.constant 0 : index
      %31 = vector.load %arg3[%c0_16, %c0_17] : memref<1x128xf32, #tpu.memory_space<vmem>>, vector<1x128xf32>
      %32 = vector.broadcast %31 : vector<1x128xf32> to vector<16x128xf32>
      %33 = arith.mulf %30, %32 : vector<16x128xf32>
      %c0_18 = arith.constant 0 : index
      %c0_19 = arith.constant 0 : index
      %34 = vector.load %arg4[%c0_18, %c0_19] : memref<1x128xf32, #tpu.memory_space<vmem>>, vector<1x128xf32>
      %35 = vector.broadcast %34 : vector<1x128xf32> to vector<16x128xf32>
      %36 = arith.addf %33, %35 : vector<16x128xf32>
      %c0_20 = arith.constant 0 : index
      %c0_21 = arith.constant 0 : index
      %37 = vector.load %arg8[%c0_20, %c0_21] : memref<16x128xf32, #tpu.memory_space<vmem>>, vector<16x128xf32>
      tpu.vector_store %arg8[%c0_20, %c0_21], %36 {strides = array<i32>} : memref<16x128xf32, #tpu.memory_space<vmem>>, vector<16x128xf32>,
    } else {
    }
    %c0 = arith.constant 0 : index
    %c0_1 = arith.constant 0 : index
    %3 = vector.load %arg8[%c0, %c0_1] : memref<16x128xf32, #tpu.memory_space<vmem>>, vector<16x128xf32>
    %c0_2 = arith.constant 0 : index
    %c0_3 = arith.constant 0 : index
    %4 = vector.load %arg5[%c0_2, %c0_3] : memref<128x128xf32, #tpu.memory_space<vmem>>, vector<128x128xf32>
    %cst = arith.constant dense<0.000000e+00> : vector<16x128xf32>
    %5 = tpu.matmul %3, %4, %cst {dimension_numbers = #tpu.dot_dimension_numbers<[1], [0], [0], [1], [0, 0, 1, 1], [], []>} : vector<16x128xf32>, vector<128x128xf32>, vector<16x128xf32> -> vector<16x128xf32>
    %c0_4 = arith.constant 0 : index
    %c0_5 = arith.constant 0 : index
    %6 = vector.load %arg6[%c0_4, %c0_5] : memref<1x128xf32, #tpu.memory_space<vmem>>, vector<1x128xf32>
    %7 = vector.broadcast %6 : vector<1x128xf32> to vector<16x128xf32>
    %8 = arith.addf %5, %7 : vector<16x128xf32>
    %c0_6 = arith.constant 0 : index
    %c0_7 = arith.constant 0 : index
    %9 = vector.load %arg7[%c0_6, %c0_7] : memref<16x128xf32, #tpu.memory_space<vmem>>, vector<16x128xf32>
    tpu.vector_store %arg7[%c0_6, %c0_7], %8 {strides = array<i32>} : memref<16x128xf32, #tpu.memory_space<vmem>>, vector<16x128xf32>,
    return
  }
  func.func @transform_0(%arg0: i32, %arg1: i32) -> (i32, i32) {
    %c0_i32 = arith.constant 0 : i32
    %c0_i32_0 = arith.constant 0 : i32
    return %arg0, %c0_i32 : i32, i32
  }
  func.func @transform_1(%arg0: i32, %arg1: i32) -> (i32, i32) {
    %c0_i32 = arith.constant 0 : i32
    %c0_i32_0 = arith.constant 0 : i32
    %c0_i32_1 = arith.constant 0 : i32
    return %c0_i32, %c0_i32_0 : i32, i32
  }
  func.func @transform_2(%arg0: i32, %arg1: i32) -> (i32, i32) {
    %c0_i32 = arith.constant 0 : i32
    %c0_i32_0 = arith.constant 0 : i32
    %c0_i32_1 = arith.constant 0 : i32
    return %c0_i32, %c0_i32_0 : i32, i32
  }
  func.func @transform_3(%arg0: i32, %arg1: i32) -> (i32, i32) {
    %c0_i32 = arith.constant 0 : i32
    %c0_i32_0 = arith.constant 0 : i32
    return %c0_i32, %arg1 : i32, i32
  }
  func.func @transform_4(%arg0: i32, %arg1: i32) -> (i32, i32) {
    %c0_i32 = arith.constant 0 : i32
    %c0_i32_0 = arith.constant 0 : i32
    return %c0_i32, %arg1 : i32, i32
  }
  func.func @transform_5(%arg0: i32, %arg1: i32) -> (i32, i32) {
    %c0_i32 = arith.constant 0 : i32
    return %arg0, %arg1 : i32, i32
  }
}

</mosaic_0001>

<bundles_post_ra>
// kernel: tpu_custom_call.1
= control target key start
LH: loop header
LB: loop body
LE: loop exit
PB: predicated region body
PF: predicated region fallthrough
CT: control target
= control target key end

     0   :  { %10 = vsyncpa [#allocation4], 0  ;;  %s428_s0 = inlined_call_operand.hbm [shape: f32[16,128], index: 0, kind: input, shape index: {}]   ;;  %s429_s1 = inlined_call_operand.vmem [shape: f32[1,128], index: 1, kind: input, shape index: {}]   ;;  %s430_s2 = inlined_call_operand.vmem [shape: f32[1,128], index: 2, kind: input, shape index: {}]   ;;  %s431_s3 = inlined_call_operand.hbm [shape: f32[128,128], index: 3, kind: input, shape index: {}]   ;;  %s432_s4 = inlined_call_operand.vmem [shape: f32[1,128], index: 4, kind: input, shape index: {}]   ;;  %s433_s5 = inlined_call_operand.hbm [shape: f32[16,128], index: 5, kind: output, shape index: {}]  }
   0x1   :  { %11 = vsyncpa [#allocation7], 0 }
   0x2   :  { %12 = vsyncpa [#allocation5], 0  ;;  %s354_s18 = smov [#allocation3]  }
   0x3   :  { %s18_s19 = sshll.u32 %s354_s18, 4  ;;  %s19_s19 = int_to_ptr.vmem [resolvable:$true] %s18_s19 }
   0x4   :  { %s296_s20 = scalar_lea.vmem %s19_s19, 256  ;;  %p301_p1 = scmp.lt.s32.totalorder %s19_s19, %s19_s19 }
   0x5   :  { %p297_p0 = scmp.ne.s32.totalorder %s19_s19, %s296_s20  ;;  %p302_p2 = scmp.lt.s32.totalorder %s296_s20, %s296_s20 }
   0x7   :  { %p303_p3 = por %p302_p2, %p301_p1 }
   0x9   :  { %p304_p4 = pnand %p303_p3, %p297_p0 }
   0xb   :  { %307 = shalt.err (!%p304_p4)
}
   0xc   :  { %s355_s21 = smov 128   ;;  %s356_s22 = smov 8  }
   0xd   :  { %24 = dma.hbm_to_vmem [thread:$0]  %s428_s0, 256, %s19_s19, [#allocation4], %s355_s21, %s355_s21, %s356_s22  }
   0xe   :  { %s357_s25 = smov [#allocation6]  }
   0xf   :  { %s34_s26 = sshll.u32 %s357_s25, 4  ;;  %s35_s26 = int_to_ptr.vmem [resolvable:$true] %s34_s26 }
  0x10   :  { %s316_s27 = scalar_lea.vmem %s35_s26, 2048  ;;  %p321_p6 = scmp.lt.s32.totalorder %s35_s26, %s35_s26 }
  0x11   :  { %p317_p5 = scmp.ne.s32.totalorder %s35_s26, %s316_s27  ;;  %p322_p7 = scmp.lt.s32.totalorder %s316_s27, %s316_s27 }
  0x13   :  { %p323_p8 = por %p322_p7, %p321_p6 }
  0x15   :  { %p324_p9 = pnand %p323_p8, %p317_p5 }
  0x17   :  { %327 = shalt.err (!%p324_p9)
}
  0x18   :  { %40 = dma.hbm_to_vmem [thread:$0]  %s431_s3, 2048, %s35_s26, [#allocation7], %s355_s21, %s355_s21, %s356_s22  }
  0x19   :  { %348 = dma.done.wait [#allocation4], 256  }
  0x1a   :  { %349 = vsyncadd [#allocation4], 4294967040 }
  0x1b   :  { %350 = dma.done.wait [#allocation7], 2048  }
  0x1c   :  { %351 = vsyncadd [#allocation7], 4294965248  ;;  %v401_v0 = vld [vmem:[#allocation3] sm:$0xff]  ;;  %v403_v1 = vld [vmem:[#allocation3 + $0x8] sm:$0xff] }
  0x1d   :  { %55 = vadd.xlane.f32.xlu0 %v401_v0  ;;  %v61_v2 = vmul.f32 %v401_v0, %v401_v0  ;;  %v62_v3 = vmul.f32 %v403_v1, %v403_v1  ;;  %v120_v4 = vld [vmem:[#allocation6 + $0x78] sm:$0xff]  ;;  %v119_v5 = vld [vmem:[#allocation6 + $0x70] sm:$0xff]  ;;  %v118_v6 = vld [vmem:[#allocation6 + $0x68] sm:$0xff] }
  0x1e   :  { %244 = vmatprep.subr.mxu0 %v120_v4  ;;  %v117_v7 = vld [vmem:[#allocation6 + $0x60] sm:$0xff]  ;;  %v116_v8 = vld [vmem:[#allocation6 + $0x58] sm:$0xff]  ;;  %v115_v9 = vld [vmem:[#allocation6 + $0x50] sm:$0xff] }
  0x1f   :  { %63 = vadd.xlane.f32.xlu1 %v61_v2  ;;  %245 = vmatpush3.msra.mxu0 %v120_v4  ;;  %v114_v10 = vld [vmem:[#allocation6 + $0x48] sm:$0xff]  ;;  %v113_v11 = vld [vmem:[#allocation6 + $0x40] sm:$0xff]  ;;  %v112_v12 = vld [vmem:[#allocation6 + $0x38] sm:$0xff] }
  0x20   :  { %246 = vmatprep.subr.mxu0 %v119_v5  ;;  %v111_v13 = vld [vmem:[#allocation6 + $0x30] sm:$0xff]  ;;  %v110_v14 = vld [vmem:[#allocation6 + $0x28] sm:$0xff]  ;;  %v109_v15 = vld [vmem:[#allocation6 + $0x20] sm:$0xff] }
  0x21   :  { %57 = vadd.xlane.f32.xlu0 %v403_v1  ;;  %247 = vmatpush3.msra.mxu0 %v119_v5  ;;  %v108_v16 = vld [vmem:[#allocation6 + $0x18] sm:$0xff]  ;;  %v107_v17 = vld [vmem:[#allocation6 + $0x10] sm:$0xff]  ;;  %v106_v18 = vld [vmem:[#allocation6 + $0x8] sm:$0xff] }
  0x22   :  { %248 = vmatprep.subr.mxu0 %v118_v6  ;;  %v105_v19 = vld [vmem:[#allocation6] sm:$0xff]  ;;  %v223_v38 = vld [vmem:[%s429_s1] ss:$0 sm:$0xff]  ;;  %s358_s1 = smov [#allocation8]  }
  0x23   :  { %65 = vadd.xlane.f32.xlu1 %v62_v3  ;;  %249 = vmatpush3.msra.mxu0 %v118_v6  ;;  %v224_v40 = vld [vmem:[%s430_s2] ss:$0 sm:$0xff]  ;;  %s210_s9 = sshll.u32 %s358_s1, 4  ;;  %s211_s9 = int_to_ptr.vmem [resolvable:$true] %s210_s9 }
  0x24   :  { %250 = vmatprep.subr.mxu0 %v117_v7  ;;  %v225_v48 = vld [vmem:[%s432_s4] ss:$0 sm:$0xff]  ;;  %s328_s2 = scalar_lea.vmem %s211_s9, 256  ;;  %p333_p11 = scmp.lt.s32.totalorder %s211_s9, %s211_s9 }
  0x25   :  { %251 = vmatpush3.msra.mxu0 %v117_v7  ;;  %p329_p10 = scmp.ne.s32.totalorder %s211_s9, %s328_s2  ;;  %p334_p12 = scmp.lt.s32.totalorder %s328_s2, %s328_s2 }
  0x26   :  { %252 = vmatprep.subr.mxu0 %v116_v8 }
  0x27   :  { %253 = vmatpush3.msra.mxu0 %v116_v8  ;;  %p335_p13 = por %p334_p12, %p333_p11 }
  0x28   :  { %254 = vmatprep.subr.mxu0 %v115_v9 }
  0x29   :  { %255 = vmatpush3.msra.mxu0 %v115_v9  ;;  %p336_p0 = pnand %p335_p13, %p329_p10 }
  0x2a   :  { %256 = vmatprep.subr.mxu0 %v114_v10 }
  0x2b   :  { %257 = vmatpush3.msra.mxu0 %v114_v10 }
  0x2c   :  { %258 = vmatprep.subr.mxu0 %v113_v11 }
  0x2d   :  { %259 = vmatpush3.msra.mxu0 %v113_v11 }
  0x2e   :  { %260 = vmatprep.subr.mxu0 %v112_v12 }
  0x2f   :  { %261 = vmatpush3.msra.mxu0 %v112_v12 }
  0x30   :  { %262 = vmatprep.subr.mxu0 %v111_v13 }
  0x31   :  { %263 = vmatpush3.msra.mxu0 %v111_v13 }
  0x32   :  { %264 = vmatprep.subr.mxu0 %v110_v14 }
  0x33   :  { %265 = vmatpush3.msra.mxu0 %v110_v14 }
  0x34   :  { %266 = vmatprep.subr.mxu0 %v109_v15 }
  0x35   :  { %267 = vmatpush3.msra.mxu0 %v109_v15 }
  0x36   :  { %268 = vmatprep.subr.mxu0 %v108_v16 }
  0x37   :  { %269 = vmatpush3.msra.mxu0 %v108_v16 }
  0x38   :  { %270 = vmatprep.subr.mxu0 %v107_v17 }
  0x39   :  { %271 = vmatpush3.msra.mxu0 %v107_v17 }
  0x3a   :  { %272 = vmatprep.subr.mxu0 %v106_v18 }
  0x3b   :  { %273 = vmatpush3.msra.mxu0 %v106_v18 }
  0x3c   :  { %274 = vmatprep.subr.mxu0 %v105_v19 }
  0x3d   :  { %275 = vmatpush3.msra.mxu0 %v105_v19 }
  0xa6   :  { %v56_v20 = vpop.xlane.xlu0 %55 }
  0xa7   :  { %v59_v21 = vmul.f32 0.03125, %v56_v20 }
  0xa8   :  { %v64_v22 = vpop.xlane.xlu1 %63 }
  0xa9   :  { %v69_v23 = vmul.f32 %v59_v21, %v59_v21  ;;  %v67_v24 = vmul.f32 0.03125, %v64_v22  ;;  %v75_v36 = vsub.f32 %v401_v0, %v59_v21 }
  0xaa   :  { %v58_v25 = vpop.xlane.xlu0 %57 }
  0xab   :  { %v71_v26 = vsub.f32 %v67_v24, %v69_v23  ;;  %v60_v27 = vmul.f32 0.03125, %v58_v25 }
  0xac   :  { %v66_v28 = vpop.xlane.xlu1 %65 }
  0xad   :  { %v73_v29 = vmax.f32 %v71_v26, 0.0  ;;  %v70_v30 = vmul.f32 %v60_v27, %v60_v27  ;;  %v68_v31 = vmul.f32 0.03125, %v66_v28  ;;  %v76_v41 = vsub.f32 %v403_v1, %v60_v27 }
  0xaf   :  { %v77_v32 = vadd.f32 1e-05, %v73_v29  ;;  %v72_v33 = vsub.f32 %v68_v31, %v70_v30 }
  0xb1   :  { %284 = vrsqrt.f32 %v77_v32  ;;  %v74_v34 = vmax.f32 %v72_v33, 0.0 }
  0xb3   :  { %v78_v35 = vadd.f32 1e-05, %v74_v34 }
  0xb5   :  { %286 = vrsqrt.f32 %v78_v35 }
  0xbe   :  { %v285_v37 = vpop.eup %284 }
  0xbf   :  { %v81_v39 = vmul.f32 %v285_v37, %v75_v36 }
  0xc1   :  { %v90_v42 = vmul.f32 %v223_v38, %v81_v39 }
  0xc2   :  { %v287_v43 = vpop.eup %286 }
  0xc3   :  { %v82_v44 = vmul.f32 %v287_v43, %v76_v41  ;;  %v99_v45 = vadd.f32 %v224_v40, %v90_v42 }
  0xc5   :  { %v91_v46 = vmul.f32 %v223_v38, %v82_v44  ;;  %276 = vmatprep.mubr.f32.mxu0 %v99_v45 }
  0xc7   :  { %v100_v47 = vadd.f32 %v224_v40, %v91_v46 }
  0xc9   :  { %277 = vmatmul.mubr.f32.vlgmr.msra.gmra.mxu0 %v100_v47 }
 0x189   :  { %v278_v49 = vpop.f32.mrf.mxu0 }
 0x18a   :  { %v200_v50 = vadd.f32 %v278_v49, %v225_v48 }
 0x18b   :  { %v194_v51 = vpop.f32.mrf.mxu0 }
 0x18c   :  { %204 = vst [vmem:[#allocation8 + $0x8] sm:$0xff] %v200_v50  ;;  %v195_v52 = vadd.f32 %v225_v48, %v194_v51 }
 0x18e   :  { %203 = vst [vmem:[#allocation8] sm:$0xff] %v195_v52 }
 0x18f   :  { %339 = shalt.err (!%p336_p0)
}
 0x190   :  { %216 = dma.vmem_to_hbm [thread:$0]  %s211_s9, 256, %s433_s5, [#allocation5], %s355_s21, %s355_s21, %s356_s22  }
 0x191   :  { %352 = dma.done.wait [#allocation5], 256  }
 0x192   :  { %353 = vsyncadd [#allocation5], 4294967040 }
 0x193   :  { %220 = vsyncpa [#allocation4], 1 }
 0x194   :  { %221 = vsyncpa [#allocation7], 1 }
 0x195   :  { %222 = vsyncpa [#allocation5], 1 }

</bundles_post_ra>
